<compile_context>
chip_gen: v6e
topology: v6e:2x2x1
jax: 0.10.0
libtpu: 0.0.40
codegen_flags: <defaults>
</compile_context>

<pallas_src>
import jax
import jax.numpy as jnp
from jax.experimental import pallas as pl
from jax.experimental.pallas import tpu as pltpu


def attention2_kernel(x_ref, w1_ref, b1_ref, w2_ref, b2_ref, o_ref):
    # Layer 1: [TILE_M, num_in] @ [num_in, 128] on the MXU, f32 accumulation.
    h = jnp.dot(x_ref[...], w1_ref[...], preferred_element_type=jnp.float32)
    h = jnp.maximum(h + b1_ref[...], 0.0)                     # bias + ReLU (VPU)
    # Layer 2 (output width 1): VPU multiply + lane reduction instead of a
    # [*,128]@[128,1] matmul that would use <1% of the MXU.
    logit = jnp.sum(h * w2_ref[...], axis=-1, keepdims=True)  # [TILE_M, 1]
    logit = logit + b2_ref[0]                                 # scalar bias from SMEM
    o_ref[...] = jax.nn.sigmoid(logit).astype(o_ref.dtype)


def _round_up(n, m):
    return ((n + m - 1) // m) * m


def attention2_forward(x, w1, b1, w2, b2, num_instances, *,
                       tile_m=1024, use_bf16=False, vmem_limit_bytes=None):
    """x: [N, num_in] float32 with N = batch * num_instances.

    Returns [N // num_instances, num_instances, 1] float32 (same math as the
    PyTorch module: Linear -> ReLU -> Linear -> reshape -> sigmoid).
    """
    N, num_in = x.shape
    hidden = w1.shape[1]

    # Tile size: multiple of 8 rows (16 for bf16 sublane packing), capped at N.
    row_align = 16 if use_bf16 else 8
    tm = min(_round_up(tile_m, row_align), _round_up(N, row_align))
    n_pad = _round_up(N, tm)
    num_tiles = n_pad // tm

    x_in = x
    if n_pad != N:
        # Pad tail rows with zeros; they are computed (sigmoid of bias) and
        # sliced off below, so they never reach the caller.
        x_in = jnp.pad(x_in, ((0, n_pad - N), (0, 0)))
    if use_bf16:
        # Halve HBM traffic for the only large tensor; MXU runs native bf16,
        # accumulation stays f32 via preferred_element_type in the kernel.
        x_in = x_in.astype(jnp.bfloat16)
        w1 = w1.astype(jnp.bfloat16)

    b1_row = jnp.asarray(b1, jnp.float32).reshape(1, hidden)
    w2_row = jnp.asarray(w2, jnp.float32).reshape(1, hidden)   # w2 pre-transposed
    b2_smem = jnp.asarray(b2, jnp.float32).reshape(1)          # scalar in SMEM

    cp_kwargs = dict(dimension_semantics=("parallel",))
    if vmem_limit_bytes is not None:  # e.g. raise v5e's 16 MiB scoped default
        cp_kwargs["vmem_limit_bytes"] = vmem_limit_bytes

    out = pl.pallas_call(
        attention2_kernel,
        out_shape=jax.ShapeDtypeStruct((n_pad, 1), jnp.float32),
        grid_spec=pltpu.PrefetchScalarGridSpec(
            num_scalar_prefetch=0,
            grid=(num_tiles,),
            in_specs=[
                # x: tiled along rows -> double-buffered stream.
                pl.BlockSpec((tm, num_in), lambda i: (i, 0)),
                # Weights / biases: constant index_map -> stay VMEM-resident.
                pl.BlockSpec((num_in, hidden), lambda i: (0, 0)),
                pl.BlockSpec((1, hidden), lambda i: (0, 0)),
                pl.BlockSpec((1, hidden), lambda i: (0, 0)),
                # b2: single scalar, keep it in SMEM.
                pl.BlockSpec(memory_space=pltpu.MemorySpace.SMEM),
            ],
            out_specs=pl.BlockSpec((tm, 1), lambda i: (i, 0)),
        ),
        compiler_params=pltpu.CompilerParams(**cp_kwargs),
    )(x_in, w1, b1_row, w2_row, b2_smem)

    out = out[:N]
    # Glue: reshape(-1, num_instances, 1) exactly as the PyTorch module does.
    return out.reshape(-1, num_instances, 1)


def init_params(key, num_in=32, hidden=128):
    """Deterministic PyTorch-style (uniform +-1/sqrt(fan_in)) init."""
    k1, k2, k3, k4 = jax.random.split(key, 4)
    lim1 = 1.0 / jnp.sqrt(num_in)
    lim2 = 1.0 / jnp.sqrt(hidden)
    w1 = jax.random.uniform(k1, (num_in, hidden), jnp.float32, -lim1, lim1)
    b1 = jax.random.uniform(k2, (1, hidden), jnp.float32, -lim1, lim1)
    w2 = jax.random.uniform(k3, (hidden, 1), jnp.float32, -lim2, lim2)
    b2 = jax.random.uniform(k4, (1, 1), jnp.float32, -lim2, lim2)
    return w1, b1, w2, b2


if __name__ == "__main__":
    key = jax.random.PRNGKey(0)
    kx, kp, kx2 = jax.random.split(key, 3)

    num_in, hidden = 32, 128
    w1, b1, w2, b2 = init_params(kp, num_in=num_in, hidden=hidden)

    def reference(xx):
        return jax.nn.sigmoid(jnp.maximum(xx @ w1 + b1, 0.0) @ w2 + b2)

    # --- Case 1: module-default small shape (batch=2, num_instances=32) -------
    num_instances = 32
    batch = 2
    N = batch * num_instances
    x = jax.random.normal(kx, (N, num_in), jnp.float32)

    out = attention2_forward(x, w1, b1, w2, b2, num_instances)
    out = jax.block_until_ready(out)
    ref = reference(x).reshape(-1, num_instances, 1)
    assert out.shape == (batch, num_instances, 1), out.shape
    assert jnp.allclose(out, ref, atol=1e-5, rtol=1e-5), "f32 small-case mismatch"

    # --- Case 2: multi-tile grid + row padding (N not a multiple of TILE_M) ---
    num_instances2 = 100
    batch2 = 5
    N2 = batch2 * num_instances2            # 500 rows -> padded to 512, 4 tiles
    x2 = jax.random.normal(kx2, (N2, num_in), jnp.float32)

    out2 = attention2_forward(x2, w1, b1, w2, b2, num_instances2, tile_m=128)
    out2 = jax.block_until_ready(out2)
    ref2 = reference(x2).reshape(-1, num_instances2, 1)
    assert out2.shape == (batch2, num_instances2, 1), out2.shape
    assert jnp.allclose(out2, ref2, atol=1e-5, rtol=1e-5), "f32 tiled-case mismatch"

    # --- Case 3: bf16 feed for x/w1 (HBM-bound path), f32 accumulation --------
    out3 = attention2_forward(x2, w1, b1, w2, b2, num_instances2,
                              tile_m=128, use_bf16=True)
    out3 = jax.block_until_ready(out3)
    assert out3.shape == (batch2, num_instances2, 1), out3.shape
    assert jnp.allclose(out3, ref2, atol=2e-2, rtol=0.0), "bf16 case mismatch"

    print("KERNEL_OK")
</pallas_src>

<mosaic_0001>
module attributes {stable_mosaic.version = 11 : i64} {
  func.func @attention2_kernel(%arg0: i32, %arg1: memref<64x32xf32, #tpu.memory_space<vmem>>, %arg2: memref<32x128xf32, #tpu.memory_space<vmem>>, %arg3: memref<1x128xf32, #tpu.memory_space<vmem>>, %arg4: memref<1x128xf32, #tpu.memory_space<vmem>>, %arg5: memref<1xf32, #tpu.memory_space<smem>>, %arg6: memref<64x1xf32, #tpu.memory_space<vmem>>) attributes {dimension_semantics = [#tpu.dimension_semantics<parallel>], iteration_bounds = array<i64: 1>, scalar_prefetch = 0 : i64, scratch_operands = 0 : i64, tpu.core_type = #tpu.core_type<tc>, window_params = [{transform_indices = @transform_0, window_bounds = array<i64: 64, 32>}, {pipeline_mode = #tpu.pipeline_mode<synchronous>, transform_indices = @transform_1, window_bounds = array<i64: 32, 128>}, {pipeline_mode = #tpu.pipeline_mode<synchronous>, transform_indices = @transform_2, window_bounds = array<i64: 1, 128>}, {pipeline_mode = #tpu.pipeline_mode<synchronous>, transform_indices = @transform_3, window_bounds = array<i64: 1, 128>}, {transform_indices = @transform_4, window_bounds = array<i64: 1>}, {transform_indices = @transform_5, window_bounds = array<i64: 64, 1>}]} {
    %c0 = arith.constant 0 : index
    %c0_0 = arith.constant 0 : index
    %0 = vector.load %arg1[%c0, %c0_0] : memref<64x32xf32, #tpu.memory_space<vmem>>, vector<64x32xf32>
    %c0_1 = arith.constant 0 : index
    %c0_2 = arith.constant 0 : index
    %1 = vector.load %arg2[%c0_1, %c0_2] : memref<32x128xf32, #tpu.memory_space<vmem>>, vector<32x128xf32>
    %cst = arith.constant dense<0.000000e+00> : vector<64x128xf32>
    %2 = tpu.matmul %0, %1, %cst {dimension_numbers = #tpu.dot_dimension_numbers<[1], [0], [0], [1], [0, 0, 1, 1], [], []>} : vector<64x32xf32>, vector<32x128xf32>, vector<64x128xf32> -> vector<64x128xf32>
    %c0_3 = arith.constant 0 : index
    %c0_4 = arith.constant 0 : index
    %3 = vector.load %arg3[%c0_3, %c0_4] : memref<1x128xf32, #tpu.memory_space<vmem>>, vector<1x128xf32>
    %4 = vector.broadcast %3 : vector<1x128xf32> to vector<64x128xf32>
    %5 = arith.addf %2, %4 : vector<64x128xf32>
    %cst_5 = arith.constant 0.000000e+00 : f32
    %6 = vector.broadcast %cst_5 : f32 to vector<64x128xf32>
    %7 = arith.maximumf %5, %6 : vector<64x128xf32>
    %c0_6 = arith.constant 0 : index
    %c0_7 = arith.constant 0 : index
    %8 = vector.load %arg4[%c0_6, %c0_7] : memref<1x128xf32, #tpu.memory_space<vmem>>, vector<1x128xf32>
    %9 = vector.broadcast %8 : vector<1x128xf32> to vector<64x128xf32>
    %10 = arith.mulf %7, %9 : vector<64x128xf32>
    %cst_8 = arith.constant dense<0.000000e+00> : vector<64xf32>
    %11 = vector.multi_reduction <add>, %10, %cst_8 [1] : vector<64x128xf32> to vector<64xf32>
    %12 = vector.shape_cast %11 : vector<64xf32> to vector<64x1xf32>
    %c0_9 = arith.constant 0 : index
    %13 = memref.load %arg5[%c0_9] : memref<1xf32, #tpu.memory_space<smem>>
    %14 = vector.broadcast %13 : f32 to vector<64x1xf32>
    %15 = arith.addf %12, %14 : vector<64x1xf32>
    %16 = arith.negf %15 : vector<64x1xf32>
    %17 = math.exp %16 : vector<64x1xf32>
    %cst_10 = arith.constant 1.000000e+00 : f32
    %18 = vector.broadcast %cst_10 : f32 to vector<64x1xf32>
    %19 = arith.addf %18, %17 : vector<64x1xf32>
    %20 = arith.divf %18, %19 : vector<64x1xf32>
    %c0_11 = arith.constant 0 : index
    %c0_12 = arith.constant 0 : index
    %21 = vector.load %arg6[%c0_11, %c0_12] : memref<64x1xf32, #tpu.memory_space<vmem>>, vector<64x1xf32>
    tpu.vector_store %arg6[%c0_11, %c0_12], %20 {strides = array<i32>} : memref<64x1xf32, #tpu.memory_space<vmem>>, vector<64x1xf32>,
    return
  }
  func.func @transform_0(%arg0: i32) -> (i32, i32) {
    %c0_i32 = arith.constant 0 : i32
    %c0_i32_0 = arith.constant 0 : i32
    return %arg0, %c0_i32 : i32, i32
  }
  func.func @transform_1(%arg0: i32) -> (i32, i32) {
    %c0_i32 = arith.constant 0 : i32
    %c0_i32_0 = arith.constant 0 : i32
    %c0_i32_1 = arith.constant 0 : i32
    return %c0_i32, %c0_i32_0 : i32, i32
  }
  func.func @transform_2(%arg0: i32) -> (i32, i32) {
    %c0_i32 = arith.constant 0 : i32
    %c0_i32_0 = arith.constant 0 : i32
    %c0_i32_1 = arith.constant 0 : i32
    return %c0_i32, %c0_i32_0 : i32, i32
  }
  func.func @transform_3(%arg0: i32) -> (i32, i32) {
    %c0_i32 = arith.constant 0 : i32
    %c0_i32_0 = arith.constant 0 : i32
    %c0_i32_1 = arith.constant 0 : i32
    return %c0_i32, %c0_i32_0 : i32, i32
  }
  func.func @transform_4(%arg0: i32) -> i32 {
    %c0_i32 = arith.constant 0 : i32
    %c0_i32_0 = arith.constant 0 : i32
    return %c0_i32 : i32
  }
  func.func @transform_5(%arg0: i32) -> (i32, i32) {
    %c0_i32 = arith.constant 0 : i32
    %c0_i32_0 = arith.constant 0 : i32
    return %arg0, %c0_i32 : i32, i32
  }
}

</mosaic_0001>

<bundles_post_ra>
// kernel: tpu_custom_call.1
= control target key start
LH: loop header
LB: loop body
LE: loop exit
PB: predicated region body
PF: predicated region fallthrough
CT: control target
= control target key end

     0   :  { %vm40_vm0 = vcmask 261120   ;;  %vm267_vm1 = vcmask 7168   ;;  %s485_s1 = inlined_call_operand.vmem [shape: f32[32,128], index: 1, kind: input, shape index: {}]   ;;  %s486_s0 = inlined_call_operand.vmem [shape: f32[64,32], index: 0, kind: input, shape index: {}]   ;;  %s487_s2 = inlined_call_operand.vmem [shape: f32[1,128], index: 2, kind: input, shape index: {}]   ;;  %s488_s3 = inlined_call_operand.vmem [shape: f32[1,128], index: 3, kind: input, shape index: {}]   ;;  %s489_s4 = inlined_call_operand.<no memory space> [shape: f32[1], index: 4, kind: input, shape index: {}]   ;;  %s490_s5 = inlined_call_operand.vmem [shape: f32[64,1], index: 5, kind: output, shape index: {}]  }
   0x1   :  { %v32_v0 = vld [vmem:[%s485_s1 + $0x18] sm:$0xff]  ;;  %v31_v1 = vld [vmem:[%s485_s1 + $0x10] sm:$0xff]  ;;  %v30_v2 = vld [vmem:[%s485_s1 + $0x8] sm:$0xff]  ;;  %v210_v46 = vstv %s489_s4 }
   0x2   :  { %310 = vmatprep.subr.mxu0 %v32_v0  ;;  %330 = vmatprep.subr.mxu1 %v32_v0  ;;  %v29_v3 = vld [vmem:[%s485_s1] sm:$0xff]  ;;  %v22_v6 = vld [vmem:[%s486_s0 + $0x8] sm:$0xff]  ;;  %v23_v8 = vld [vmem:[%s486_s0 + $0x10] sm:$0xff] }
   0x3   :  { %311 = vmatpush3.msra.mxu0 %v32_v0  ;;  %334 = vmatpush3.msra.mxu1 %v32_v0  ;;  %v21_v4 = vld [vmem:[%s486_s0] sm:$0xff]  ;;  %v26_v7 = vld [vmem:[%s486_s0 + $0x28] sm:$0xff]  ;;  %v27_v9 = vld [vmem:[%s486_s0 + $0x30] sm:$0xff] }
   0x4   :  { %312 = vmatprep.subr.mxu0 %v31_v1  ;;  %331 = vmatprep.subr.mxu1 %v31_v1  ;;  %v25_v5 = vld [vmem:[%s486_s0 + $0x20] sm:$0xff]  ;;  %v24_v10 = vld [vmem:[%s486_s0 + $0x18] sm:$0xff] }
   0x5   :  { %313 = vmatpush3.msra.mxu0 %v31_v1  ;;  %335 = vmatpush3.msra.mxu1 %v31_v1  ;;  %v28_v11 = vld [vmem:[%s486_s0 + $0x38] sm:$0xff]  ;;  %v280_v12 = vld [vmem:[%s487_s2] ss:$0 sm:$0xff] }
   0x6   :  { %314 = vmatprep.subr.mxu0 %v30_v2  ;;  %332 = vmatprep.subr.mxu1 %v30_v2  ;;  %v289_v19 = vld [vmem:[%s488_s3] ss:$0 sm:$0xff] }
   0x7   :  { %315 = vmatpush3.msra.mxu0 %v30_v2  ;;  %336 = vmatpush3.msra.mxu1 %v30_v2 }
   0x8   :  { %316 = vmatprep.subr.mxu0 %v29_v3  ;;  %333 = vmatprep.subr.mxu1 %v29_v3 }
   0x9   :  { %317 = vmatpush3.msra.mxu0 %v29_v3  ;;  %337 = vmatpush3.msra.mxu1 %v29_v3 }
   0xa   :  { %318 = vmatprep.mubr.msk.f32.mxu0 %vm40_vm0, %v21_v4  ;;  %324 = vmatprep.mubr.msk.f32.mxu1 %vm40_vm0, %v25_v5 }
   0xb   :  { %319 = vmatmul.mubr.msk.f32.vlgmr.msra.gmra.mxu0 %vm40_vm0, %v22_v6  ;;  %325 = vmatmul.mubr.msk.f32.vlgmr.msra.gmra.mxu1 %vm40_vm0, %v26_v7 }
   0xc   :  { %321 = vmatprep.mubr.msk.f32.mxu0 %vm40_vm0, %v23_v8  ;;  %327 = vmatprep.mubr.msk.f32.mxu1 %vm40_vm0, %v27_v9 }
   0xf   :  { %322 = vmatmul.mubr.msk.f32.gmra.mxu0 %vm40_vm0, %v24_v10  ;;  %328 = vmatmul.mubr.msk.f32.gmra.mxu1 %vm40_vm0, %v28_v11 }
  0xcb   :  { %v320_v13 = vpop.f32.mrf.mxu0  ;;  %v326_v14 = vpop.f32.mrf.mxu1 }
  0xcc   :  { %v137_v15 = vadd.f32 %v320_v13, %v280_v12  ;;  %v157_v16 = vadd.f32 %v326_v14, %v280_v12 }
  0xcd   :  { %v131_v17 = vpop.f32.mrf.mxu0  ;;  %v151_v18 = vpop.f32.mrf.mxu1 }
  0xce   :  { %v171_v20 = vmax.f32 %v137_v15, 0.0  ;;  %v175_v21 = vmax.f32 %v157_v16, 0.0  ;;  %v132_v22 = vadd.f32 %v280_v12, %v131_v17  ;;  %v152_v28 = vadd.f32 %v280_v12, %v151_v18 }
  0xcf   :  { %v323_v23 = vpop.f32.mrf.mxu0  ;;  %v329_v24 = vpop.f32.mrf.mxu1 }
  0xd0   :  { %v147_v25 = vadd.f32 %v323_v23, %v280_v12  ;;  %v190_v26 = vmul.f32 %v289_v19, %v175_v21  ;;  %v170_v27 = vmax.f32 %v132_v22, 0.0  ;;  %v186_v30 = vmul.f32 %v289_v19, %v171_v20 }
  0xd1   :  { %v141_v29 = vpop.f32.mrf.mxu0  ;;  %v161_v33 = vpop.f32.mrf.mxu1  ;;  %v167_v35 = vadd.f32 %v329_v24, %v280_v12  ;;  %v174_v37 = vmax.f32 %v152_v28, 0.0 }
  0xd2   :  { %v173_v31 = vmax.f32 %v147_v25, 0.0  ;;  %v142_v32 = vadd.f32 %v280_v12, %v141_v29  ;;  %203 = vadd.xlane.f32.xlu1 %v190_v26  ;;  %195 = vadd.xlane.f32.xlu0 %v186_v30  ;;  %v162_v38 = vadd.f32 %v280_v12, %v161_v33  ;;  %v185_v39 = vmul.f32 %v289_v19, %v170_v27 }
  0xd3   :  { %v177_v40 = vmax.f32 %v167_v35, 0.0  ;;  %v189_v43 = vmul.f32 %v289_v19, %v174_v37 }
  0xd4   :  { %v172_v34 = vmax.f32 %v142_v32, 0.0  ;;  %v188_v36 = vmul.f32 %v289_v19, %v173_v31  ;;  %v176_v42 = vmax.f32 %v162_v38, 0.0 }
  0xd5   :  { %v192_v44 = vmul.f32 %v289_v19, %v177_v40 }
  0xd6   :  { %199 = vadd.xlane.f32.xlu1 %v188_v36  ;;  %193 = vadd.xlane.f32.xlu0 %v185_v39  ;;  %v187_v41 = vmul.f32 %v289_v19, %v172_v34  ;;  %v191_v45 = vmul.f32 %v289_v19, %v176_v42 }
  0xda   :  { %197 = vadd.xlane.f32.xlu1 %v187_v41  ;;  %201 = vadd.xlane.f32.xlu0 %v189_v43 }
  0xde   :  { %207 = vadd.xlane.f32.xlu1 %v192_v44  ;;  %205 = vadd.xlane.f32.xlu0 %v191_v45 }
 0x15b   :  { %v204_v47 = vpop.xlane.xlu1 %203  ;;  %v196_v49 = vpop.xlane.xlu0 %195 }
 0x15c   :  { %v216_v48 = vadd.f32 %v210_v46, %v204_v47  ;;  %v212_v50 = vadd.f32 %v210_v46, %v196_v49 }
 0x15e   :  { %v295_v51 = vmul.f32 -1.442695, %v216_v48  ;;  %v291_v52 = vmul.f32 -1.442695, %v212_v50 }
 0x15f   :  { %v200_v53 = vpop.xlane.xlu1 %199  ;;  %v194_v55 = vpop.xlane.xlu0 %193 }
 0x160   :  { %338 = vpow2.f32 %v295_v51  ;;  %v214_v54 = vadd.f32 %v210_v46, %v200_v53  ;;  %v211_v56 = vadd.f32 %v210_v46, %v194_v55 }
 0x161   :  { %340 = vpow2.f32 %v291_v52 }
 0x162   :  { %v293_v57 = vmul.f32 -1.442695, %v214_v54  ;;  %v290_v58 = vmul.f32 -1.442695, %v211_v56 }
 0x163   :  { %v198_v59 = vpop.xlane.xlu1 %197  ;;  %v202_v61 = vpop.xlane.xlu0 %201 }
 0x164   :  { %342 = vpow2.f32 %v293_v57  ;;  %v213_v60 = vadd.f32 %v210_v46, %v198_v59  ;;  %v215_v62 = vadd.f32 %v210_v46, %v202_v61 }
 0x165   :  { %344 = vpow2.f32 %v290_v58 }
 0x166   :  { %v292_v63 = vmul.f32 -1.442695, %v213_v60  ;;  %v294_v0 = vmul.f32 -1.442695, %v215_v62 }
 0x167   :  { %v208_v1 = vpop.xlane.xlu1 %207  ;;  %v206_v3 = vpop.xlane.xlu0 %205 }
 0x168   :  { %346 = vpow2.f32 %v292_v63  ;;  %v218_v2 = vadd.f32 %v210_v46, %v208_v1  ;;  %v217_v4 = vadd.f32 %v210_v46, %v206_v3 }
 0x169   :  { %348 = vpow2.f32 %v294_v0 }
 0x16a   :  { %v297_v5 = vmul.f32 -1.442695, %v218_v2  ;;  %v296_v6 = vmul.f32 -1.442695, %v217_v4 }
 0x16c   :  { %350 = vpow2.f32 %v297_v5 }
 0x16d   :  { %v339_v7 = vpop.eup %338  ;;  %352 = vpow2.f32 %v296_v6 }
 0x16e   :  { %v341_v8 = vpop.eup %340  ;;  %v248_v9 = vadd.f32 1.0, %v339_v7 }
 0x16f   :  { %v244_v10 = vadd.f32 1.0, %v341_v8 }
 0x170   :  { %354 = vrcp.f32 %v248_v9 }
 0x171   :  { %v343_v11 = vpop.eup %342  ;;  %356 = vrcp.f32 %v244_v10 }
 0x172   :  { %v345_v12 = vpop.eup %344  ;;  %v246_v13 = vadd.f32 1.0, %v343_v11 }
 0x173   :  { %v243_v14 = vadd.f32 1.0, %v345_v12 }
 0x174   :  { %358 = vrcp.f32 %v246_v13 }
 0x175   :  { %v347_v15 = vpop.eup %346  ;;  %360 = vrcp.f32 %v243_v14 }
 0x176   :  { %v349_v16 = vpop.eup %348  ;;  %v245_v17 = vadd.f32 1.0, %v347_v15 }
 0x177   :  { %v247_v18 = vadd.f32 1.0, %v349_v16 }
 0x178   :  { %362 = vrcp.f32 %v245_v17 }
 0x179   :  { %v351_v19 = vpop.eup %350  ;;  %364 = vrcp.f32 %v247_v18 }
 0x17a   :  { %v353_v20 = vpop.eup %352  ;;  %v250_v21 = vadd.f32 1.0, %v351_v19 }
 0x17b   :  { %v249_v22 = vadd.f32 1.0, %v353_v20 }
 0x17c   :  { %366 = vrcp.f32 %v250_v21 }
 0x17d   :  { %v355_v23 = vpop.eup %354  ;;  %368 = vrcp.f32 %v249_v22 }
 0x17e   :  { %v357_v24 = vpop.eup %356  ;;  %273 = vst.msk [vmem:[%s490_s5 + $0x28] sm:$0xff] %vm267_vm1, %v355_v23 }
 0x17f   :  { %269 = vst.msk [vmem:[%s490_s5 + $0x8] sm:$0xff] %vm267_vm1, %v357_v24 }
 0x181   :  { %v359_v25 = vpop.eup %358 }
 0x182   :  { %v361_v26 = vpop.eup %360  ;;  %271 = vst.msk [vmem:[%s490_s5 + $0x18] sm:$0xff] %vm267_vm1, %v359_v25 }
 0x183   :  { %268 = vst.msk [vmem:[%s490_s5] sm:$0xff] %vm267_vm1, %v361_v26 }
 0x185   :  { %v363_v27 = vpop.eup %362 }
 0x186   :  { %v365_v28 = vpop.eup %364  ;;  %270 = vst.msk [vmem:[%s490_s5 + $0x10] sm:$0xff] %vm267_vm1, %v363_v27 }
 0x187   :  { %272 = vst.msk [vmem:[%s490_s5 + $0x20] sm:$0xff] %vm267_vm1, %v365_v28 }
 0x189   :  { %v367_v29 = vpop.eup %366 }
 0x18a   :  { %v369_v30 = vpop.eup %368  ;;  %275 = vst.msk [vmem:[%s490_s5 + $0x38] sm:$0xff] %vm267_vm1, %v367_v29 }
 0x18b   :  { %274 = vst.msk [vmem:[%s490_s5 + $0x30] sm:$0xff] %vm267_vm1, %v369_v30 }

</bundles_post_ra>
